<compile_context>
chip_gen: v6e
topology: v6e:2x2x1
jax: 0.10.0
libtpu: 0.0.40
codegen_flags: <defaults>
</compile_context>

<pallas_src>
import jax
import jax.numpy as jnp
from jax.experimental import pallas as pl
from jax.experimental.pallas import tpu as pltpu


_LANE_CANDIDATES = (4096, 2048, 1024, 512, 256, 128)
# ~2 MiB per f32 operand block.
_TARGET_BLOCK_ELEMS = 512 * 1024


def _weighted_sum_kernel(w1_ref, w2_ref, x1_ref, x2_ref, o_ref):
    # w1_ref / w2_ref are (1,) f32 scalars in SMEM; cast once so the FMA stays
    # in the input dtype (no per-element f32 round trip for sub-32-bit inputs).
    w1 = w1_ref[0].astype(x1_ref.dtype)
    w2 = w2_ref[0].astype(x2_ref.dtype)
    o_ref[...] = (x1_ref[...] * w1 + x2_ref[...] * w2).astype(o_ref.dtype)


def _choose_lane_width(n):
    for lw in _LANE_CANDIDATES:
        if n % lw == 0:
            return lw
    return None


def _run_slab(x1, x2, w1s, w2s, tile_rows, out_dtype):
    rows, lanes = x1.shape
    grid = (pl.cdiv(rows, tile_rows),)
    return pl.pallas_call(
        _weighted_sum_kernel,
        out_shape=jax.ShapeDtypeStruct((rows, lanes), out_dtype),
        grid_spec=pltpu.PrefetchScalarGridSpec(
            num_scalar_prefetch=0,
            grid=grid,
            in_specs=[
                pl.BlockSpec(memory_space=pltpu.SMEM),                 # w1
                pl.BlockSpec(memory_space=pltpu.SMEM),                 # w2
                pl.BlockSpec((tile_rows, lanes), lambda i: (i, 0)),    # input1
                pl.BlockSpec((tile_rows, lanes), lambda i: (i, 0)),    # input2
            ],
            out_specs=pl.BlockSpec((tile_rows, lanes), lambda i: (i, 0)),
        ),
        compiler_params=pltpu.CompilerParams(
            # single 'parallel' axis: shards across the 2 TCs on v7x, no-op on v5e/v6e
            dimension_semantics=("parallel",),
            # headroom above the scoped default; well under every generation's physical VMEM
            vmem_limit_bytes=48 * 1024 * 1024,
        ),
    )(w1s, w2s, x1, x2)


def weighted_sum(input1, input2, w1, w2):
    """out = input1 * w1 + input2 * w2  (w1, w2 are scalar parameters)."""
    assert input1.shape == input2.shape
    orig_shape = input1.shape
    out_dtype = input1.dtype
    n = input1.size

    itemsize = jnp.dtype(out_dtype).itemsize
    sublane = max(8, 32 // itemsize)  # 8 for f32, 16 for bf16, 32 for int8/fp8

    # Scalar params as (1,) f32 for SMEM.
    w1s = jnp.asarray(w1, jnp.float32).reshape(1)
    w2s = jnp.asarray(w2, jnp.float32).reshape(1)

    lane_width = _choose_lane_width(n)
    if lane_width is None:
        # TODO(synk): flat length not a multiple of 128 -> minimal pad-to-128 fallback
        # (copy); the main path below is copy-free.
        pad = (-n) % 128
        lane_width = 128
        x1 = jnp.pad(input1.reshape(-1), (0, pad)).reshape(-1, lane_width)
        x2 = jnp.pad(input2.reshape(-1), (0, pad)).reshape(-1, lane_width)
        padded = True
    else:
        # Row-major flatten/reshape of a contiguous array: no extra HBM copy.
        x1 = input1.reshape(-1, lane_width)
        x2 = input2.reshape(-1, lane_width)
        padded = False

    rows = x1.shape[0]
    target_rows = max(sublane, (_TARGET_BLOCK_ELEMS // lane_width) // sublane * sublane)
    # Either the full row extent (always a legal block dim) or a sublane-aligned
    # ~2 MiB block; a ragged last grid step is masked by Pallas.
    tile_rows = rows if rows <= target_rows else target_rows

    out = _run_slab(x1, x2, w1s, w2s, tile_rows, out_dtype)

    if padded:
        return out.reshape(-1)[:n].reshape(orig_shape)
    return out.reshape(orig_shape)


if __name__ == "__main__":
    key = jax.random.PRNGKey(0)
    k1, k2, k3, k4 = jax.random.split(key, 4)

    # Small NCHW inputs, consistent with the elementwise forward of weighted_sum.
    B, C, H, W = 2, 4, 16, 16
    input1 = jax.random.normal(k1, (B, C, H, W), dtype=jnp.float32)
    input2 = jax.random.normal(k2, (B, C, H, W), dtype=jnp.float32)

    # Deterministic scalar parameters (nn.Parameter(torch.FloatTensor(1)) each).
    w1 = jax.random.normal(k3, (1,), dtype=jnp.float32)[0]
    w2 = jax.random.normal(k4, (1,), dtype=jnp.float32)[0]

    out = weighted_sum(input1, input2, w1, w2)
    out = jax.block_until_ready(out)

    ref = input1 * w1 + input2 * w2
    assert out.shape == ref.shape
    assert jnp.allclose(out, ref, atol=1e-6, rtol=1e-6)

    print("KERNEL_OK")
</pallas_src>

<mosaic_0001>
module attributes {stable_mosaic.version = 11 : i64} {
  func.func @_weighted_sum_kernel(%arg0: i32, %arg1: memref<1xf32, #tpu.memory_space<smem>>, %arg2: memref<1xf32, #tpu.memory_space<smem>>, %arg3: memref<1x2048xf32, #tpu.memory_space<vmem>>, %arg4: memref<1x2048xf32, #tpu.memory_space<vmem>>, %arg5: memref<1x2048xf32, #tpu.memory_space<vmem>>) attributes {dimension_semantics = [#tpu.dimension_semantics<parallel>], iteration_bounds = array<i64: 1>, scalar_prefetch = 0 : i64, scratch_operands = 0 : i64, tpu.core_type = #tpu.core_type<tc>, window_params = [{transform_indices = @transform_0, window_bounds = array<i64: 1>}, {transform_indices = @transform_1, window_bounds = array<i64: 1>}, {transform_indices = @transform_2, window_bounds = array<i64: 1, 2048>}, {transform_indices = @transform_3, window_bounds = array<i64: 1, 2048>}, {transform_indices = @transform_4, window_bounds = array<i64: 1, 2048>}]} {
    %c0 = arith.constant 0 : index
    %0 = memref.load %arg1[%c0] : memref<1xf32, #tpu.memory_space<smem>>
    %c0_0 = arith.constant 0 : index
    %1 = memref.load %arg2[%c0_0] : memref<1xf32, #tpu.memory_space<smem>>
    %c0_1 = arith.constant 0 : index
    %c0_2 = arith.constant 0 : index
    %2 = vector.load %arg3[%c0_1, %c0_2] : memref<1x2048xf32, #tpu.memory_space<vmem>>, vector<1x2048xf32>
    %3 = vector.broadcast %0 : f32 to vector<1x2048xf32>
    %4 = arith.mulf %2, %3 : vector<1x2048xf32>
    %c0_3 = arith.constant 0 : index
    %c0_4 = arith.constant 0 : index
    %5 = vector.load %arg4[%c0_3, %c0_4] : memref<1x2048xf32, #tpu.memory_space<vmem>>, vector<1x2048xf32>
    %6 = vector.broadcast %1 : f32 to vector<1x2048xf32>
    %7 = arith.mulf %5, %6 : vector<1x2048xf32>
    %8 = arith.addf %4, %7 : vector<1x2048xf32>
    %c0_5 = arith.constant 0 : index
    %c0_6 = arith.constant 0 : index
    %9 = vector.load %arg5[%c0_5, %c0_6] : memref<1x2048xf32, #tpu.memory_space<vmem>>, vector<1x2048xf32>
    tpu.vector_store %arg5[%c0_5, %c0_6], %8 {strides = array<i32>} : memref<1x2048xf32, #tpu.memory_space<vmem>>, vector<1x2048xf32>,
    return
  }
  func.func @transform_0(%arg0: i32) -> i32 {
    %c0_i32 = arith.constant 0 : i32
    %c0_i32_0 = arith.constant 0 : i32
    return %c0_i32 : i32
  }
  func.func @transform_1(%arg0: i32) -> i32 {
    %c0_i32 = arith.constant 0 : i32
    %c0_i32_0 = arith.constant 0 : i32
    return %c0_i32 : i32
  }
  func.func @transform_2(%arg0: i32) -> (i32, i32) {
    %c0_i32 = arith.constant 0 : i32
    %c0_i32_0 = arith.constant 0 : i32
    return %arg0, %c0_i32 : i32, i32
  }
  func.func @transform_3(%arg0: i32) -> (i32, i32) {
    %c0_i32 = arith.constant 0 : i32
    %c0_i32_0 = arith.constant 0 : i32
    return %arg0, %c0_i32 : i32, i32
  }
  func.func @transform_4(%arg0: i32) -> (i32, i32) {
    %c0_i32 = arith.constant 0 : i32
    %c0_i32_0 = arith.constant 0 : i32
    return %arg0, %c0_i32 : i32, i32
  }
}

</mosaic_0001>

<bundles_post_ra>
// kernel: tpu_custom_call.1
= control target key start
LH: loop header
LB: loop body
LE: loop exit
PB: predicated region body
PF: predicated region fallthrough
CT: control target
= control target key end

     0   :  { %11 = vsyncpa [#allocation5], 0  ;;  %s188_s0 = inlined_call_operand.<no memory space> [shape: f32[1], index: 0, kind: input, shape index: {}]   ;;  %s189_s1 = inlined_call_operand.<no memory space> [shape: f32[1], index: 1, kind: input, shape index: {}]   ;;  %s190_s2 = inlined_call_operand.hbm [shape: f32[1,2048], index: 2, kind: input, shape index: {}]   ;;  %s191_s3 = inlined_call_operand.hbm [shape: f32[1,2048], index: 3, kind: input, shape index: {}]   ;;  %s192_s4 = inlined_call_operand.hbm [shape: f32[1,2048], index: 4, kind: output, shape index: {}]  }
   0x1   :  { %12 = vsyncpa [#allocation8], 0 }
   0x2   :  { %13 = vsyncpa [#allocation6], 0  ;;  %s145_s15 = smov [#allocation4]   ;;  %s146_s17 = smov [#allocation7]  }
   0x3   :  { %s24_s16 = sshll.u32 %s145_s15, 4  ;;  %s34_s18 = sshll.u32 %s146_s17, 4  ;;  %s25_s16 = int_to_ptr.vmem [resolvable:$true] %s24_s16  ;;  %s35_s18 = int_to_ptr.vmem [resolvable:$true] %s34_s18 }
   0x4   :  { %s87_s19 = scalar_lea.vmem %s25_s16, 256  ;;  %p92_p1 = scmp.lt.s32.totalorder %s25_s16, %s25_s16 }
   0x5   :  { %p88_p0 = scmp.ne.s32.totalorder %s25_s16, %s87_s19  ;;  %p93_p2 = scmp.lt.s32.totalorder %s87_s19, %s87_s19 }
   0x7   :  { %p94_p3 = por %p93_p2, %p92_p1 }
   0x9   :  { %p95_p4 = pnand %p94_p3, %p88_p0 }
   0xb   :  { %98 = shalt.err (!%p95_p4)
}
   0xc   :  { %27 = dma.hbm_to_vmem [thread:$0]  %s190_s2, 256, %s25_s16, [#allocation5]  }
   0xd   :  { %s107_s22 = scalar_lea.vmem %s35_s18, 256  ;;  %p112_p6 = scmp.lt.s32.totalorder %s35_s18, %s35_s18 }
   0xe   :  { %p108_p5 = scmp.ne.s32.totalorder %s35_s18, %s107_s22  ;;  %p113_p7 = scmp.lt.s32.totalorder %s107_s22, %s107_s22 }
  0x10   :  { %p114_p8 = por %p113_p7, %p112_p6 }
  0x12   :  { %p115_p9 = pnand %p114_p8, %p108_p5 }
  0x14   :  { %118 = shalt.err (!%p115_p9)
}
  0x15   :  { %37 = dma.hbm_to_vmem [thread:$0]  %s191_s3, 256, %s35_s18, [#allocation8]  }
  0x16   :  { %139 = dma.done.wait [#allocation5], 256  }
  0x17   :  { %140 = vsyncadd [#allocation5], 4294967040 }
  0x18   :  { %141 = dma.done.wait [#allocation8], 256  }
  0x19   :  { %142 = vsyncadd [#allocation8], 4294967040  ;;  %v48_v0 = vstv %s188_s0  ;;  %v53_v1 = vstv %s189_s1  ;;  %v46_v2 = vld [vmem:[#allocation4] sm:$0xff]  ;;  %v51_v3 = vld [vmem:[#allocation7] sm:$0xff]  ;;  %s147_s3 = smov [#allocation9]  }
  0x1a   :  { %v47_v4 = vld [vmem:[#allocation4 + $0x8] sm:$0xff]  ;;  %v49_v5 = vmul.f32 %v48_v0, %v46_v2  ;;  %v54_v6 = vmul.f32 %v53_v1, %v51_v3  ;;  %v52_v8 = vld [vmem:[#allocation7 + $0x8] sm:$0xff]  ;;  %s66_s28 = sshll.u32 %s147_s3, 4  ;;  %s67_s28 = int_to_ptr.vmem [resolvable:$true] %s66_s28 }
  0x1b   :  { %v50_v7 = vmul.f32 %v48_v0, %v47_v4  ;;  %v55_v9 = vmul.f32 %v53_v1, %v52_v8  ;;  %s119_s0 = scalar_lea.vmem %s67_s28, 256  ;;  %p124_p11 = scmp.lt.s32.totalorder %s67_s28, %s67_s28 }
  0x1c   :  { %v56_v10 = vadd.f32 %v54_v6, %v49_v5  ;;  %p120_p10 = scmp.ne.s32.totalorder %s67_s28, %s119_s0  ;;  %p125_p12 = scmp.lt.s32.totalorder %s119_s0, %s119_s0 }
  0x1d   :  { %v57_v11 = vadd.f32 %v55_v9, %v50_v7 }
  0x1e   :  { %58 = vst [vmem:[#allocation9] sm:$0xff] %v56_v10  ;;  %p126_p13 = por %p125_p12, %p124_p11 }
  0x1f   :  { %59 = vst [vmem:[#allocation9 + $0x8] sm:$0xff] %v57_v11 }
  0x20   :  { %p127_p0 = pnand %p126_p13, %p120_p10 }
  0x22   :  { %130 = shalt.err (!%p127_p0)
}
  0x23   :  { %69 = dma.vmem_to_hbm [thread:$0]  %s67_s28, 256, %s192_s4, [#allocation6]  }
  0x24   :  { %143 = dma.done.wait [#allocation6], 256  }
  0x25   :  { %144 = vsyncadd [#allocation6], 4294967040 }
  0x26   :  { %73 = vsyncpa [#allocation5], 1 }
  0x27   :  { %74 = vsyncpa [#allocation8], 1 }
  0x28   :  { %75 = vsyncpa [#allocation6], 1 }

</bundles_post_ra>
